<compile_context>
chip_gen: v7x
topology: tpu7x:2x2x1
jax: 0.10.0
libtpu: 0.0.40
codegen_flags: <defaults>
</compile_context>

<pallas_src>
import functools

import jax
import jax.numpy as jnp
from jax import lax
from jax.experimental import pallas as pl
from jax.experimental.pallas import tpu as pltpu

LN_EPS = 1e-5  # torch.nn.LayerNorm default


# --------------------------------------------------------------------------- #
# Kernels
# --------------------------------------------------------------------------- #
def _ffn_resident_kernel(x_ref, packd_ref, w1_ref, b1_ref, w2_ref, o_ref):
    """Grid = (row_tiles,). W1/W2/b1 have constant block indices -> fetched once
    and kept VMEM-resident across all row tiles."""
    x = x_ref[...].astype(jnp.float32)                      # (TM, D)
    packd = packd_ref[...]                                  # (3, D) f32
    gamma = packd[0:1, :]
    beta = packd[1:2, :]
    b2 = packd[2:3, :]

    mean = jnp.mean(x, axis=-1, keepdims=True)
    centered = x - mean
    var = jnp.mean(centered * centered, axis=-1, keepdims=True)
    xn = centered * lax.rsqrt(var + LN_EPS) * gamma + beta

    h = jnp.dot(xn.astype(w1_ref.dtype), w1_ref[...],
                preferred_element_type=jnp.float32)         # (TM, DFF) f32
    h = jnp.maximum(h + b1_ref[...].astype(jnp.float32), 0.0)
    y = jnp.dot(h.astype(w2_ref.dtype), w2_ref[...],
                preferred_element_type=jnp.float32)         # (TM, D) f32
    o_ref[...] = (x + y + b2).astype(o_ref.dtype)


def _ffn_streaming_kernel(x_ref, packd_ref, w1_ref, b1_ref, w2_ref, o_ref,
                          xn_ref, acc_ref):
    """Grid = (row_tiles, dff_tiles). Scratch: xn (bf16), acc (f32).
    Used only when the full weights do not fit the VMEM budget."""
    j = pl.program_id(1)

    # ---- First DFF tile: LayerNorm the row tile once, init the accumulator ----
    @pl.when(j == 0)
    def _():
        x = x_ref[...].astype(jnp.float32)                  # (TM, D)
        packd = packd_ref[...]                              # (3, D) f32
        gamma = packd[0:1, :]
        beta = packd[1:2, :]
        b2 = packd[2:3, :]
        mean = jnp.mean(x, axis=-1, keepdims=True)
        centered = x - mean
        var = jnp.mean(centered * centered, axis=-1, keepdims=True)
        xn = centered * lax.rsqrt(var + LN_EPS) * gamma + beta
        xn_ref[...] = xn.astype(xn_ref.dtype)               # bf16 for the MXU
        acc_ref[...] = x + b2                               # residual + out-bias

    # ---- Linear1 (D x tkff) -> ReLU -> partial Linear2 (tkff x D) ----
    h = jnp.dot(xn_ref[...], w1_ref[...],
                preferred_element_type=jnp.float32)         # (TM, tkff) f32
    h = jnp.maximum(h + b1_ref[...].astype(jnp.float32), 0.0)
    acc_ref[...] += jnp.dot(h.astype(w2_ref.dtype), w2_ref[...],
                            preferred_element_type=jnp.float32)

    # ---- Last DFF tile: write the finished row tile ----
    @pl.when(j == pl.num_programs(1) - 1)
    def _():
        o_ref[...] = acc_ref[...].astype(o_ref.dtype)


# --------------------------------------------------------------------------- #
# Planning helpers
# --------------------------------------------------------------------------- #
def _round_up(v, m):
    return (v + m - 1) // m * m


def _cdiv(a, b):
    return -(-a // b)


def _vmem_budget_bytes():
    """~0.8x of physical per-core VMEM; conservative fallback = v7x (64 MiB)."""
    cap = None
    get_info = getattr(pltpu, "get_tpu_info", None)
    if get_info is not None:
        try:
            cap = getattr(get_info(), "vmem_capacity_bytes", None)
        except Exception:
            cap = None
    if cap is None:
        cap = 64 * 1024 * 1024
    return int(cap * 0.8)


def _choose_row_tiling(rows, tm_cap):
    """Balanced row tiles (multiple of 8); >=2 tiles when possible (megacore)."""
    tm_cap = max(8, (tm_cap // 8) * 8)
    n_tiles = max(1, _cdiv(rows, tm_cap))
    if n_tiles < 2 and rows > 8:
        n_tiles = 2                      # feed both TensorCores on v7x megacore
    tm = _round_up(_cdiv(rows, n_tiles), 8)
    rows_pad = _round_up(rows, tm)
    return tm, rows_pad


def _resident_bytes(tm, D, DFF):
    """Conservative VMEM estimate for the weight-resident plan."""
    weights = 2 * 2 * (D * DFF * 2)          # W1 + W2, bf16, double-buffered
    io = 2 * 2 * tm * D * 4                  # x-in + out tiles, f32, double-buffered
    locals_ = tm * DFF * 4 + 2 * tm * D * 4  # h intermediate + LN temps
    small = 2 * (3 * D * 4 + DFF * 4) * 2    # packd + b1
    return weights + io + locals_ + small


def _streaming_bytes(tm, D, tkff):
    """Conservative VMEM estimate for one step of the DFF-streaming plan."""
    weights = 2 * 2 * (D * tkff * 2)         # W1/W2 DFF-slices, bf16, double-buffered
    io = 2 * 2 * tm * D * 4                  # x-in + out tiles
    scratch = tm * D * (2 + 4)               # xn (bf16) + acc (f32) scratch
    locals_ = tm * tkff * 4 + tm * D * 4     # h intermediate + LN temps
    small = 2 * (3 * D * 4 + tkff * 4) * 2
    return weights + io + scratch + locals_ + small


def _plan(rows, D, DFF, budget):
    # 1) Prefer weight residency: weights DMA'd once, single row-tile grid axis.
    for tm_cap in (512, 256, 128, 64, 32, 16, 8):
        tm, rows_pad = _choose_row_tiling(rows, tm_cap)
        if _resident_bytes(tm, D, DFF) <= budget:
            return dict(mode="resident", tm=tm, rows_pad=rows_pad,
                        tkff=DFF, dff_pad=DFF)
    # 2) Stream DFF-slices; large row tiles raise flops/weight-byte (v6e roofline).
    for tm_cap in (1024, 512, 256, 128, 64, 32, 16, 8):
        tm, rows_pad = _choose_row_tiling(rows, tm_cap)
        for quantum in (256, 128):           # 256 fills v6e/v7x MXU; 128 for v5e
            tkff = (min(_round_up(DFF, quantum), 4096) // quantum) * quantum
            while tkff >= quantum:
                if _streaming_bytes(tm, D, tkff) <= budget:
                    return dict(mode="stream", tm=tm, rows_pad=rows_pad,
                                tkff=tkff, dff_pad=_round_up(DFF, tkff))
                tkff -= quantum
    # 3) Last resort: minimal tiles even if the conservative estimate is exceeded.
    tm, rows_pad = _choose_row_tiling(rows, 8)
    return dict(mode="stream", tm=tm, rows_pad=rows_pad,
                tkff=128, dff_pad=_round_up(DFF, 128))


# --------------------------------------------------------------------------- #
# Public wrapper
# --------------------------------------------------------------------------- #
@functools.partial(jax.jit, static_argnames=("plan_vmem_budget",))
def decoder_ffn_sublayer(x, gamma, beta, w1, b1, w2, b2, *, plan_vmem_budget=None):
    """x: (B, S, D) -> (B, S, D).  Weights stored (in_features, out_features).

    plan_vmem_budget overrides only the tiling plan (testing hook); the compiler
    VMEM limit always follows the real hardware budget.
    """
    B, S, D = x.shape
    DFF = w1.shape[1]
    assert D % 128 == 0, "d_model must be a multiple of 128 for lane-dense tiles"

    rows = B * S
    hw_budget = _vmem_budget_bytes()
    budget = hw_budget if plan_vmem_budget is None else int(plan_vmem_budget)
    plan = _plan(rows, D, DFF, budget)
    tm = plan["tm"]
    rows_pad = plan["rows_pad"]
    tkff = plan["tkff"]
    dff_pad = plan["dff_pad"]
    n_row_tiles = rows_pad // tm

    x2d = x.reshape(rows, D)
    if rows_pad != rows:
        x2d = jnp.pad(x2d, ((0, rows_pad - rows), (0, 0)))

    f32 = jnp.float32
    # Pack the small per-D parameters into one constant (3, D) buffer.
    packd = jnp.stack(
        [gamma.astype(f32), beta.astype(f32), b2.astype(f32)], axis=0)  # (3, D)
    b1_2 = b1.astype(f32).reshape(1, DFF)
    # bf16 weights -> higher MXU throughput, half the weight DMA / VMEM bytes.
    w1_bf = w1.astype(jnp.bfloat16)
    w2_bf = w2.astype(jnp.bfloat16)
    if dff_pad != DFF:
        # Zero-padded hidden columns: ReLU(0 + 0) = 0 -> contribute nothing.
        pad = dff_pad - DFF
        w1_bf = jnp.pad(w1_bf, ((0, 0), (0, pad)))
        b1_2 = jnp.pad(b1_2, ((0, 0), (0, pad)))
        w2_bf = jnp.pad(w2_bf, ((0, pad), (0, 0)))

    if plan["mode"] == "resident":
        grid = (n_row_tiles,)
        in_specs = [
            pl.BlockSpec((tm, D), lambda i: (i, 0)),          # x row tile
            pl.BlockSpec((3, D), lambda i: (0, 0)),           # gamma/beta/b2
            pl.BlockSpec((D, dff_pad), lambda i: (0, 0)),     # W1, VMEM-resident
            pl.BlockSpec((1, dff_pad), lambda i: (0, 0)),     # b1, VMEM-resident
            pl.BlockSpec((dff_pad, D), lambda i: (0, 0)),     # W2, VMEM-resident
        ]
        out_specs = pl.BlockSpec((tm, D), lambda i: (i, 0))
        scratch_shapes = []
        kernel = _ffn_resident_kernel
        dim_sem = ("parallel",)
        weight_bytes = (w1_bf.size + w2_bf.size) * 2          # fetched once
    else:
        grid = (n_row_tiles, dff_pad // tkff)
        in_specs = [
            pl.BlockSpec((tm, D), lambda i, j: (i, 0)),       # x row tile
            pl.BlockSpec((3, D), lambda i, j: (0, 0)),        # gamma/beta/b2
            pl.BlockSpec((D, tkff), lambda i, j: (0, j)),     # W1 DFF-slice
            pl.BlockSpec((1, tkff), lambda i, j: (0, j)),     # b1 DFF-slice
            pl.BlockSpec((tkff, D), lambda i, j: (j, 0)),     # W2 DFF-slice
        ]
        out_specs = pl.BlockSpec((tm, D), lambda i, j: (i, 0))
        scratch_shapes = [
            pltpu.VMEM((tm, D), jnp.bfloat16),                # LayerNorm'd rows
            pltpu.VMEM((tm, D), jnp.float32),                 # f32 accumulator
        ]
        kernel = _ffn_streaming_kernel
        dim_sem = ("parallel", "arbitrary")
        # Weights are re-streamed once per row tile in this mode.
        weight_bytes = n_row_tiles * (w1_bf.size + w2_bf.size) * 2

    bytes_accessed = (
        2 * rows_pad * D * x.dtype.itemsize                   # x in + out
        + weight_bytes                                        # actual weight traffic
        + (packd.size + b1_2.size) * 4)                       # small f32 params
    cost = pl.CostEstimate(flops=4 * rows_pad * D * dff_pad,
                           transcendentals=rows_pad,
                           bytes_accessed=int(bytes_accessed))

    vmem_limit = int(min(hw_budget, 100 * 1024 * 1024))

    out2d = pl.pallas_call(
        kernel,
        out_shape=jax.ShapeDtypeStruct((rows_pad, D), x.dtype),
        grid=grid,
        in_specs=in_specs,
        out_specs=out_specs,
        scratch_shapes=scratch_shapes,
        compiler_params=pltpu.CompilerParams(
            dimension_semantics=dim_sem,
            vmem_limit_bytes=vmem_limit),
        cost_estimate=cost,
    )(x2d, packd, w1_bf, b1_2, w2_bf)

    if rows_pad != rows:
        out2d = out2d[:rows]
    return out2d.reshape(B, S, D)


# --------------------------------------------------------------------------- #
# References
# --------------------------------------------------------------------------- #
def _reference_bf16(x, gamma, beta, w1, b1, w2, b2):
    """Pure-JAX reference with the same bf16-in / f32-accumulate dtype policy."""
    xf = x.astype(jnp.float32)
    mean = jnp.mean(xf, axis=-1, keepdims=True)
    var = jnp.mean((xf - mean) ** 2, axis=-1, keepdims=True)
    xn = (xf - mean) * lax.rsqrt(var + LN_EPS) * gamma + beta
    h = jnp.dot(xn.astype(jnp.bfloat16), w1.astype(jnp.bfloat16),
                preferred_element_type=jnp.float32) + b1
    h = jnp.maximum(h, 0.0)
    y = jnp.dot(h.astype(jnp.bfloat16), w2.astype(jnp.bfloat16),
                preferred_element_type=jnp.float32) + b2
    return (y + xf).astype(x.dtype)


def _reference_f32(x, gamma, beta, w1, b1, w2, b2):
    """Full-f32 (torch-semantics) reference."""
    xf = x.astype(jnp.float32)
    mean = jnp.mean(xf, axis=-1, keepdims=True)
    var = jnp.mean((xf - mean) ** 2, axis=-1, keepdims=True)
    xn = (xf - mean) * lax.rsqrt(var + LN_EPS) * gamma + beta
    h = jnp.maximum(xn @ w1 + b1, 0.0)
    y = h @ w2 + b2
    return (y + xf).astype(x.dtype)


# --------------------------------------------------------------------------- #
# Demo / self-test
# --------------------------------------------------------------------------- #
if __name__ == "__main__":
    # Small shapes consistent with (batch, seq_len, d_model); D lane-dense.
    B, S, D, DFF = 2, 8, 128, 256

    key = jax.random.PRNGKey(0)
    kx, kg, kb, kw1, kb1, kw2, kb2 = jax.random.split(key, 7)

    x = jax.random.normal(kx, (B, S, D), dtype=jnp.float32)

    # LayerNorm(d_model): gamma (D,), beta (D,)
    # FeedForward: Linear(D, DFF) -> ReLU -> Dropout -> Linear(DFF, D)
    gamma = 1.0 + 0.1 * jax.random.normal(kg, (D,), dtype=jnp.float32)
    beta = 0.1 * jax.random.normal(kb, (D,), dtype=jnp.float32)
    w1 = jax.random.normal(kw1, (D, DFF), dtype=jnp.float32) * (D ** -0.5)
    b1 = 0.01 * jax.random.normal(kb1, (DFF,), dtype=jnp.float32)
    w2 = jax.random.normal(kw2, (DFF, D), dtype=jnp.float32) * (DFF ** -0.5)
    b2 = 0.01 * jax.random.normal(kb2, (D,), dtype=jnp.float32)

    # TODO(synk): dropout (p=0.1) is identity here (eval mode); training-mode
    # stochastic dropout would use pltpu.prng_seed / pltpu.prng_random_bits.

    ref_bf16 = _reference_bf16(x, gamma, beta, w1, b1, w2, b2)
    ref_f32 = _reference_f32(x, gamma, beta, w1, b1, w2, b2)

    # 1) Default plan: full weights fit VMEM -> weight-resident kernel.
    out = decoder_ffn_sublayer(x, gamma, beta, w1, b1, w2, b2)
    out = jax.block_until_ready(out)
    assert out.shape == (B, S, D)
    assert jnp.allclose(out, ref_bf16, atol=1e-3, rtol=1e-3), \
        "resident kernel: mismatch vs bf16-matched reference"
    assert jnp.allclose(out, ref_f32, atol=1e-1, rtol=5e-2), \
        "resident kernel: mismatch vs f32 reference beyond bf16 tolerance"

    # 2) Force the DFF-streaming kernel (tiny planning budget) to exercise it too.
    out_s = decoder_ffn_sublayer(x, gamma, beta, w1, b1, w2, b2,
                                 plan_vmem_budget=200 * 1024)
    out_s = jax.block_until_ready(out_s)
    assert jnp.allclose(out_s, ref_bf16, atol=1e-3, rtol=1e-3), \
        "streaming kernel: mismatch vs bf16-matched reference"

    print("KERNEL_OK")
</pallas_src>

<mosaic_0001>
module attributes {stable_mosaic.version = 11 : i64} {
  func.func @_ffn_resident_kernel(%arg0: i32, %arg1: memref<8x128xf32, #tpu.memory_space<vmem>>, %arg2: memref<3x128xf32, #tpu.memory_space<vmem>>, %arg3: memref<128x256xbf16, #tpu.memory_space<vmem>>, %arg4: memref<1x256xf32, #tpu.memory_space<vmem>>, %arg5: memref<256x128xbf16, #tpu.memory_space<vmem>>, %arg6: memref<8x128xf32, #tpu.memory_space<vmem>>) attributes {dimension_semantics = [#tpu.dimension_semantics<parallel>], iteration_bounds = array<i64: 2>, scalar_prefetch = 0 : i64, scratch_operands = 0 : i64, tpu.core_type = #tpu.core_type<tc>, window_params = [{transform_indices = @transform_0, window_bounds = array<i64: 8, 128>}, {pipeline_mode = #tpu.pipeline_mode<synchronous>, transform_indices = @transform_1, window_bounds = array<i64: 3, 128>}, {pipeline_mode = #tpu.pipeline_mode<synchronous>, transform_indices = @transform_2, window_bounds = array<i64: 128, 256>}, {pipeline_mode = #tpu.pipeline_mode<synchronous>, transform_indices = @transform_3, window_bounds = array<i64: 1, 256>}, {pipeline_mode = #tpu.pipeline_mode<synchronous>, transform_indices = @transform_4, window_bounds = array<i64: 256, 128>}, {transform_indices = @transform_5, window_bounds = array<i64: 8, 128>}]} {
    %c0 = arith.constant 0 : index
    %c0_0 = arith.constant 0 : index
    %0 = vector.load %arg1[%c0, %c0_0] : memref<8x128xf32, #tpu.memory_space<vmem>>, vector<8x128xf32>
    %c0_1 = arith.constant 0 : index
    %c0_2 = arith.constant 0 : index
    %1 = vector.load %arg2[%c0_1, %c0_2] : memref<3x128xf32, #tpu.memory_space<vmem>>, vector<3x128xf32>
    %2 = vector.extract_strided_slice %1 {offsets = [0, 0], sizes = [1, 128], strides = [1, 1]} : vector<3x128xf32> to vector<1x128xf32>
    %3 = vector.extract_strided_slice %1 {offsets = [1, 0], sizes = [1, 128], strides = [1, 1]} : vector<3x128xf32> to vector<1x128xf32>
    %4 = vector.extract_strided_slice %1 {offsets = [2, 0], sizes = [1, 128], strides = [1, 1]} : vector<3x128xf32> to vector<1x128xf32>
    %cst = arith.constant dense<0.000000e+00> : vector<8xf32>
    %5 = vector.multi_reduction <add>, %0, %cst [1] : vector<8x128xf32> to vector<8xf32>
    %6 = vector.shape_cast %5 : vector<8xf32> to vector<8x1xf32>
    %cst_3 = arith.constant 1.280000e+02 : f32
    %7 = vector.broadcast %cst_3 : f32 to vector<8x1xf32>
    %8 = arith.divf %6, %7 : vector<8x1xf32>
    %9 = vector.broadcast %8 : vector<8x1xf32> to vector<8x128xf32>
    %10 = arith.subf %0, %9 : vector<8x128xf32>
    %11 = arith.mulf %10, %10 : vector<8x128xf32>
    %cst_4 = arith.constant dense<0.000000e+00> : vector<8xf32>
    %12 = vector.multi_reduction <add>, %11, %cst_4 [1] : vector<8x128xf32> to vector<8xf32>
    %13 = vector.shape_cast %12 : vector<8xf32> to vector<8x1xf32>
    %cst_5 = arith.constant 1.280000e+02 : f32
    %14 = vector.broadcast %cst_5 : f32 to vector<8x1xf32>
    %15 = arith.divf %13, %14 : vector<8x1xf32>
    %cst_6 = arith.constant 9.99999974E-6 : f32
    %16 = vector.broadcast %cst_6 : f32 to vector<8x1xf32>
    %17 = arith.addf %15, %16 : vector<8x1xf32>
    %18 = math.rsqrt %17 : vector<8x1xf32>
    %19 = vector.broadcast %18 : vector<8x1xf32> to vector<8x128xf32>
    %20 = arith.mulf %10, %19 : vector<8x128xf32>
    %21 = vector.broadcast %2 : vector<1x128xf32> to vector<8x128xf32>
    %22 = arith.mulf %20, %21 : vector<8x128xf32>
    %23 = vector.broadcast %3 : vector<1x128xf32> to vector<8x128xf32>
    %24 = arith.addf %22, %23 : vector<8x128xf32>
    %25 = arith.truncf %24 : vector<8x128xf32> to vector<8x128xbf16>
    %c0_7 = arith.constant 0 : index
    %c0_8 = arith.constant 0 : index
    %26 = vector.load %arg3[%c0_7, %c0_8] : memref<128x256xbf16, #tpu.memory_space<vmem>>, vector<128x256xbf16>
    %cst_9 = arith.constant dense<0.000000e+00> : vector<8x256xf32>
    %27 = tpu.matmul %25, %26, %cst_9 {dimension_numbers = #tpu.dot_dimension_numbers<[1], [0], [0], [1], [0, 0, 1, 1], [], []>} : vector<8x128xbf16>, vector<128x256xbf16>, vector<8x256xf32> -> vector<8x256xf32>
    %c0_10 = arith.constant 0 : index
    %c0_11 = arith.constant 0 : index
    %28 = vector.load %arg4[%c0_10, %c0_11] : memref<1x256xf32, #tpu.memory_space<vmem>>, vector<1x256xf32>
    %29 = vector.broadcast %28 : vector<1x256xf32> to vector<8x256xf32>
    %30 = arith.addf %27, %29 : vector<8x256xf32>
    %cst_12 = arith.constant 0.000000e+00 : f32
    %31 = vector.broadcast %cst_12 : f32 to vector<8x256xf32>
    %32 = arith.maximumf %30, %31 : vector<8x256xf32>
    %33 = arith.truncf %32 : vector<8x256xf32> to vector<8x256xbf16>
    %c0_13 = arith.constant 0 : index
    %c0_14 = arith.constant 0 : index
    %34 = vector.load %arg5[%c0_13, %c0_14] : memref<256x128xbf16, #tpu.memory_space<vmem>>, vector<256x128xbf16>
    %cst_15 = arith.constant dense<0.000000e+00> : vector<8x128xf32>
    %35 = tpu.matmul %33, %34, %cst_15 {dimension_numbers = #tpu.dot_dimension_numbers<[1], [0], [0], [1], [0, 0, 1, 1], [], []>} : vector<8x256xbf16>, vector<256x128xbf16>, vector<8x128xf32> -> vector<8x128xf32>
    %36 = arith.addf %0, %35 : vector<8x128xf32>
    %37 = vector.broadcast %4 : vector<1x128xf32> to vector<8x128xf32>
    %38 = arith.addf %36, %37 : vector<8x128xf32>
    %c0_16 = arith.constant 0 : index
    %c0_17 = arith.constant 0 : index
    %39 = vector.load %arg6[%c0_16, %c0_17] : memref<8x128xf32, #tpu.memory_space<vmem>>, vector<8x128xf32>
    tpu.vector_store %arg6[%c0_16, %c0_17], %38 {strides = array<i32>} : memref<8x128xf32, #tpu.memory_space<vmem>>, vector<8x128xf32>,
    return
  }
  func.func @transform_0(%arg0: i32) -> (i32, i32) {
    %c0_i32 = arith.constant 0 : i32
    %c0_i32_0 = arith.constant 0 : i32
    return %arg0, %c0_i32 : i32, i32
  }
  func.func @transform_1(%arg0: i32) -> (i32, i32) {
    %c0_i32 = arith.constant 0 : i32
    %c0_i32_0 = arith.constant 0 : i32
    %c0_i32_1 = arith.constant 0 : i32
    return %c0_i32, %c0_i32_0 : i32, i32
  }
  func.func @transform_2(%arg0: i32) -> (i32, i32) {
    %c0_i32 = arith.constant 0 : i32
    %c0_i32_0 = arith.constant 0 : i32
    %c0_i32_1 = arith.constant 0 : i32
    return %c0_i32, %c0_i32_0 : i32, i32
  }
  func.func @transform_3(%arg0: i32) -> (i32, i32) {
    %c0_i32 = arith.constant 0 : i32
    %c0_i32_0 = arith.constant 0 : i32
    %c0_i32_1 = arith.constant 0 : i32
    return %c0_i32, %c0_i32_0 : i32, i32
  }
  func.func @transform_4(%arg0: i32) -> (i32, i32) {
    %c0_i32 = arith.constant 0 : i32
    %c0_i32_0 = arith.constant 0 : i32
    %c0_i32_1 = arith.constant 0 : i32
    return %c0_i32, %c0_i32_0 : i32, i32
  }
  func.func @transform_5(%arg0: i32) -> (i32, i32) {
    %c0_i32 = arith.constant 0 : i32
    %c0_i32_0 = arith.constant 0 : i32
    return %arg0, %c0_i32 : i32, i32
  }
}

</mosaic_0001>

<bundles_post_ra>
// kernel: decoder_ffn_sublayer.1
= control target key start
LH: loop header
LB: loop body
LE: loop exit
PB: predicated region body
PF: predicated region fallthrough
CT: control target
= control target key end

     0   :  { %10 = vsyncpa [#allocation3], 0  ;;  %s1096_s0 = inlined_call_operand.vmem [shape: f32[16,128], index: 0, kind: input, shape index: {}]   ;;  %s1097_s1 = inlined_call_operand.vmem [shape: f32[3,128], index: 1, kind: input, shape index: {}]   ;;  %s1098_s2 = inlined_call_operand.vmem [shape: bf16[128,256], index: 2, kind: input, shape index: {}]   ;;  %s1099_s3 = inlined_call_operand.vmem [shape: f32[1,256], index: 3, kind: input, shape index: {}]   ;;  %s1100_s4 = inlined_call_operand.vmem [shape: bf16[256,128], index: 4, kind: input, shape index: {}]   ;;  %s1101_s5 = inlined_call_operand.hbm [shape: f32[16,128], index: 5, kind: output, shape index: {}]  }
   0x1   :  { %12 = vsyncpa [#allocation3 + $0x1], 0  ;;  %s889_s18 = smov 0   ;;  %s891_s19 = smov 0  }
   0x2   :  { %s893_s20 = smov 0   ;;  %s895_s21 = smov 0  }
   0x3 LB: > { %s910_s22 = sadd.s32 4294967295, %s855_s21   ;;  %s647_s23 = sadd.s32 4294967294, %s855_s21   ;;  %s855_s21 = sphi %s895_s21, %s1107_s21   ;;  %s851_s20 = sphi %s893_s20, %s1106_s20   ;;  %s847_s19 = sphi %s891_s19, %s1105_s19   ;;  %s843_s18 = sphi %s889_s18, %s1104_s18  }
   0x4   : > { %s914_s24 = sadd.s32 1, %s855_s21   ;;  %s135_s25 = sadd.s32 1, %s851_s20 }
   0x5   : > { %s132_s26 = ssub.s32 %s855_s21, %s914_s24  ;;  %p145_p0 = scmp.ne.s32.totalorder %s851_s20, %s847_s19 }
   0x6   : > { %p133_p1 = scmp.eq.s32.totalorder %s132_s26, 0  ;;  %p146_p2 = scmp.eq.s32.totalorder %s910_s22, 1 }
   0x7   : > { %p151_p3 = scmp.ne.s32.totalorder %s847_s19, %s843_s18  ;;  %p152_p4 = scmp.eq.s32.totalorder %s647_s23, 1 }
   0x8   : > { %s925_s27 = scalar_select %p133_p1, %s851_s20, %s135_s25  }
   0x9   : > { %p927_p5 = por %p146_p2, %p145_p0  ;;  %p931_p6 = por %p152_p4, %p151_p3 }
   0xa   : > { %p650_p7 = scmp.ge.s32.totalorder %s855_s21, 1  ;;  %p189_p8 = scmp.lt.s32.totalorder %s855_s21, 3 }
   0xc   : > { %p190_p9 = pnand %p650_p7, %p189_p8 }
   0xd   : > { %p216_p10 = scmp.lt.s32.totalorder (!%p190_p9), %s910_s22, 1  ;;  %v751_v1 = vld [vmem:[%s1098_s2 + $0x4] ss:$8 sps:$4 sm:$0xff] (!%p190_p9)   ;;  %v753_v2 = vld [vmem:[%s1098_s2] ss:$8 sps:$4 sm:$0xff] (!%p190_p9)   ;;  %v857_v16 = vmov (!%p190_p9), 0   ;;  %v235_v36 = vlaneseq (!%p190_p9) }
   0xe   : > { %193 = sbr.rel (%p190_p9) target bundleno = 792 (0x318), region = 40  ;;  %v754_v3 = vld [vmem:[%s1098_s2 + $0x14] ss:$8 sps:$4 sm:$0xff] (!%p190_p9)   ;;  %354 = vmatprep.subr.bf16.mxu0 (!%p190_p9), %v751_v1  ;;  %v756_v4 = vld [vmem:[%s1098_s2 + $0x10] ss:$8 sps:$4 sm:$0xff] (!%p190_p9)   ;;  %386 = vmatprep.mubr.bf16.mxu0 (!%p190_p9), %v857_v16  ;;  %v775_v22 = vld [vmem:[%s1100_s4 + $0x40] sm:$0xff] (!%p190_p9)  }
   0xf   : > { %355 = vmatpush1.bf16.msra.mxu0 (!%p190_p9), %v753_v2  ;;  %v757_v5 = vld [vmem:[%s1098_s2 + $0x24] ss:$8 sps:$4 sm:$0xff] (!%p190_p9)   ;;  %v759_v10 = vld [vmem:[%s1098_s2 + $0x20] ss:$8 sps:$4 sm:$0xff] (!%p190_p9)   ;;  %v760_v11 = vld [vmem:[%s1098_s2 + $0x34] ss:$8 sps:$4 sm:$0xff] (!%p190_p9)   ;;  %689 = vmatprep.subr.bf16.mxu1 (!%p190_p9), %v775_v22 }
  0x10   : > { %356 = vmatprep.subr.bf16.mxu0 (!%p190_p9), %v754_v3  ;;  %v762_v12 = vld [vmem:[%s1098_s2 + $0x30] ss:$8 sps:$4 sm:$0xff] (!%p190_p9)   ;;  %v763_v13 = vld [vmem:[%s1098_s2 + $0x44] ss:$8 sps:$4 sm:$0xff] (!%p190_p9)   ;;  %v765_v14 = vld [vmem:[%s1098_s2 + $0x40] ss:$8 sps:$4 sm:$0xff] (!%p190_p9)  }
  0x11   : > { %v766_v15 = vld [vmem:[%s1098_s2 + $0x54] ss:$8 sps:$4 sm:$0xff] (!%p190_p9)   ;;  %v768_v17 = vld [vmem:[%s1098_s2 + $0x50] ss:$8 sps:$4 sm:$0xff] (!%p190_p9)   ;;  %v769_v18 = vld [vmem:[%s1098_s2 + $0x64] ss:$8 sps:$4 sm:$0xff] (!%p190_p9)  }
  0x12   : > { %v771_v19 = vld [vmem:[%s1098_s2 + $0x60] ss:$8 sps:$4 sm:$0xff] (!%p190_p9)   ;;  %v772_v20 = vld [vmem:[%s1098_s2 + $0x74] ss:$8 sps:$4 sm:$0xff] (!%p190_p9)   ;;  %v774_v21 = vld [vmem:[%s1098_s2 + $0x70] ss:$8 sps:$4 sm:$0xff] (!%p190_p9)  }
  0x13   : > { %357 = vmatpush1.bf16.msra.mxu0 (!%p190_p9), %v756_v4  ;;  %v776_v23 = vld [vmem:[%s1100_s4] sm:$0xff] (!%p190_p9)   ;;  %v777_v24 = vld [vmem:[%s1100_s4 + $0x48] sm:$0xff] (!%p190_p9)   ;;  %v779_v26 = vld [vmem:[%s1100_s4 + $0x50] sm:$0xff] (!%p190_p9)   ;;  %v236_v38 = vshrl.u32 (!%p190_p9), %v235_v36, 7  ;;  %s213_s14 = sand.u32 (!%p190_p9), 1, %s847_s19   ;;  %s686_s16 = sshll.u32 (!%p190_p9), %s910_s22, 7 }
  0x14   : > { %358 = vmatprep.subr.bf16.mxu0 (!%p190_p9), %v757_v5  ;;  %690 = vmatpush3.bf16.msra.mxu1 (!%p190_p9), %v776_v23  ;;  %v778_v25 = vld [vmem:[%s1100_s4 + $0x8] sm:$0xff] (!%p190_p9)   ;;  %v780_v27 = vld [vmem:[%s1100_s4 + $0x10] sm:$0xff] (!%p190_p9)   ;;  %v781_v28 = vld [vmem:[%s1100_s4 + $0x58] sm:$0xff] (!%p190_p9)   ;;  %s651_s15 = sshll.u32 (!%p190_p9), %s213_s14, 3 }
  0x15   : > { %s217_s30 = scalar_select %p216_p10, %s910_s22, 1  ;;  %691 = vmatprep.subr.bf16.mxu1 %v777_v24  ;;  %v782_v29 = vld [vmem:[%s1100_s4 + $0x18] sm:$0xff]   ;;  %v783_v30 = vld [vmem:[%s1100_s4 + $0x60] sm:$0xff]   ;;  %v785_v32 = vld [vmem:[%s1100_s4 + $0x68] sm:$0xff]   ;;  %v237_v39 = vsub.s32 0, %v236_v38  ;;  %v242_v41 = vsub.s32 1, %v236_v38 }
  0x16   : > { %v784_v31 = vld [vmem:[%s1100_s4 + $0x20] sm:$0xff]   ;;  %v786_v33 = vld [vmem:[%s1100_s4 + $0x28] sm:$0xff]   ;;  %v787_v49 = vld [vmem:[%s1100_s4 + $0x70] sm:$0xff]   ;;  %v570_v3 = vsub.s32 2, %v236_v38  ;;  %s215_s17 = scalar_lea.vmem [#allocation2], %s651_s15  ;;  %s858_s22 = smov [#allocation2]  }
  0x17   : > { %s652_s6 = sshll.u32 %s217_s30, 3  ;;  %359 = vmatpush1.bf16.msra.mxu0 %v759_v10  ;;  %v222_v40 = vld [vmem:[%s1097_s1] sm:$0x7]  ;;  %v788_v50 = vld [vmem:[%s1100_s4 + $0x30] sm:$0xff]   ;;  %v789_v51 = vld [vmem:[%s1100_s4 + $0x78] sm:$0xff]   ;;  %s588_s23 = sshll.u32 %s215_s17, 4  ;;  %s1056_s23 = int_to_ptr.vmem [resolvable:$true] %s588_s23 }
  0x18   : > { %s219_s9 = scalar_lea.vmem %s1096_s0, %s652_s6  ;;  %360 = vmatprep.subr.bf16.mxu0 %v760_v11  ;;  %692 = vmatpush3.bf16.msra.mxu1 %v778_v25  ;;  %v238_v42 = vrot.slane %v222_v40, %v237_v39  ;;  %v243_v45 = vrot.slane %v222_v40, %v242_v41  ;;  %v790_v52 = vld [vmem:[%s1100_s4 + $0x38] sm:$0xff]   ;;  %v262_v53 = vld [vmem:[%s1099_s3] sm:$0x3]  ;;  %s1054_s30 = scalar_lea.hbm %s1101_s5, %s686_s16 }
  0x19   : > { %v942_v0 = vld [vmem:[%s219_s9] sm:$0xff]  ;;  %693 = vmatprep.subr.bf16.mxu1 %v779_v26  ;;  %v267_v54 = vrot.slane %v262_v53, %v237_v39  ;;  %v271_v55 = vrot.slane %v262_v53, %v242_v41  ;;  %s575_s6 = scalar_lea.sflag [#allocation3], %s213_s14  ;;  %s793_s7 = scalar_lea.vmem %s1056_s23, 128 }
  0x1a   : > { %223 = vadd.xlane.f32.xlu0 %v942_v0  ;;  %p794_p11 = scmp.ne.s32.totalorder %s1056_s23, %s793_s7  ;;  %s797_s8 = sshll.u32 %s858_s22, 4  ;;  %s798_s8 = int_to_ptr.vmem [resolvable:$false] %s797_s8 }
  0x1b   : > { %361 = vmatpush1.bf16.msra.mxu0 %v762_v12  ;;  %s799_s9 = scalar_lea.vmem %s798_s8, 256  ;;  %p800_p0 = scmp.lt.s32.totalorder %s1056_s23, %s798_s8 }
  0x1c   : > { %362 = vmatprep.subr.bf16.mxu0 %v763_v13  ;;  %694 = vmatpush3.bf16.msra.mxu1 %v780_v27  ;;  %p795_p12 = pnand %p794_p11, %p927_p5  ;;  %p801_p1 = scmp.lt.s32.totalorder %s799_s9, %s793_s7 }
  0x1d   : > { %695 = vmatprep.subr.bf16.mxu1 %v781_v28 }
  0x1e   : > { %p796_p13 = pneg %p795_p12  ;;  %p802_p2 = por %p801_p1, %p800_p0 }
  0x1f   : > { %363 = vmatpush1.bf16.msra.mxu0 %v765_v14 }
  0x20   : > { %364 = vmatprep.subr.bf16.mxu0 %v766_v15  ;;  %696 = vmatpush3.bf16.msra.mxu1 %v782_v29  ;;  %p803_p3 = pnand %p802_p2, %p796_p13 }
  0x21   : > { %697 = vmatprep.subr.bf16.mxu1 %v783_v30 }
  0x23   : > { %365 = vmatpush1.bf16.msra.mxu0 %v768_v17 }
  0x24   : > { %366 = vmatprep.subr.bf16.mxu0 %v769_v18  ;;  %698 = vmatpush3.bf16.msra.mxu1 %v784_v31 }
  0x25   : > { %699 = vmatprep.subr.bf16.mxu1 %v785_v32 }
  0x27   : > { %367 = vmatpush1.bf16.msra.mxu0 %v771_v19 }
  0x28   : > { %368 = vmatprep.subr.bf16.mxu0 %v772_v20  ;;  %700 = vmatpush3.bf16.msra.mxu1 %v786_v33 }
  0x29   : > { %701 = vmatprep.subr.bf16.mxu1 %v787_v49 }
  0x2b   : > { %369 = vmatpush1.bf16.msra.mxu0 %v774_v21 }
  0x2c   : > { %702 = vmatpush3.bf16.msra.mxu1 %v788_v50 }
  0x2d   : > { %703 = vmatprep.subr.bf16.mxu1 %v789_v51 }
  0x30   : > { %704 = vmatpush3.bf16.msra.mxu1 %v790_v52 }
  0xa7   : > { %v224_v6 = vpop.xlane.xlu0 %223 }
  0xa8   : > { %v226_v7 = vmul.f32 0.0078125, %v224_v6 }
  0xaa   : > { %v227_v8 = vsub.f32 %v942_v0, %v226_v7  ;;  %v571_v7 = vrot.slane %v222_v40, %v570_v3 }
  0xac   : > { %v228_v9 = vmul.f32 %v227_v8, %v227_v8 }
  0xae   : > { %229 = vadd.xlane.f32.xlu0 %v228_v9 }
 0x13b   : > { %v230_v34 = vpop.xlane.xlu0 %229 }
 0x13c   : > { %v231_v35 = vmul.f32 0.0078125, %v230_v34 }
 0x13e   : > { %v232_v37 = vadd.f32 1e-05, %v231_v35 }
 0x140   : > { %791 = vrsqrt.f32 %v232_v37 }
 0x14a   : > { %v792_v43 = vpop.eup %791 }
 0x14b   : > { %v234_v44 = vmul.f32 %v792_v43, %v227_v8 }
 0x14d   : > { %v239_v46 = vmul.f32 %v238_v42, %v234_v44 }
 0x14f   : > { %v244_v47 = vadd.f32 %v243_v45, %v239_v46 }
 0x151   : > { %v245_v48 = vpack.c.bf16 %v244_v47, %v244_v47 }
 0x153   : > { %387 = vmatmul.mubr.bf16.vlgmr.msra.gmra.mrb[0].mxu0 %v245_v48 }
 0x226   : > { %v388_v56 = vpop.f32.mrb[0].mxu0 }
 0x227   : > { %v389_v57 = vadd.f32 %v388_v56, %v267_v54  ;;  %v390_v58 = vpop.f32.mrb[1].mxu0 }
 0x228   : > { %v391_v59 = vadd.f32 %v390_v58, %v271_v55  ;;  %v392_v60 = vpop.f32.mrb[2].mxu0 }
 0x229   : > { %v395_v61 = vmax.f32 %v389_v57, 0.0  ;;  %v393_v62 = vpop.f32.mrb[3].mxu0 }
 0x22a   : > { %v396_v63 = vmax.f32 %v391_v59, 0.0 }
 0x22b   : > { %v397_v2 = vpack.c.bf16 %v395_v61, %v395_v61 }
 0x22c   : > { %v398_v1 = vpack.c.bf16 %v396_v63, %v396_v63 }
 0x22e   : > { %559 = vmatprep.mubr.bf16.mxu1 %v398_v1 }
 0x22f   : > { %560 = vmatmul.mubr.bf16.vlgmr.msra.gmra.mrb[0].mxu1 %v397_v2 }
 0x302   : > { %v705_v4 = vpop.f32.mrb[0].mxu1 }
 0x303   : > { %v706_v5 = vpop.f32.mrb[1].mxu1 }
 0x304   : > { %v707_v6 = vadd.f32 %v706_v5, %v705_v4  ;;  %v708_v8 = vpop.f32.mrb[2].mxu1 }
 0x305   : > { %v709_v9 = vpop.f32.mrb[3].mxu1 }
 0x306   : > { %v567_v10 = vadd.f32 %v707_v6, %v942_v0 }
 0x308   : > { %v572_v11 = vadd.f32 %v571_v7, %v567_v10 }
 0x30a   : > { %573 = vst [vmem:[%s215_s17] sm:$0xff] %v572_v11 }
 0x30b   : > { %806 = shalt.err (!%p803_p3)
}
 0x30c   : > { %s807_s10 = scalar_lea.hbm %s1054_s30, 128  ;;  %s811_s13 = scalar_lea.hbm %s1101_s5, 256 }
 0x30d   : > { %p808_p4 = scmp.ne.s32.totalorder %s1054_s30, %s807_s10  ;;  %p812_p9 = scmp.lt.u32.totalorder %s1054_s30, %s1101_s5 }
 0x30e   : > { %p813_p10 = scmp.lt.u32.totalorder %s811_s13, %s807_s10  ;;  %p815_p12 = scmp.lt.u32.totalorder %s807_s10, %s1054_s30 }
 0x30f   : > { %p809_p7 = pnand %p808_p4, %p927_p5 }
 0x310   : > { %p814_p11 = por %p813_p10, %p812_p9 }
 0x311   : > { %p810_p8 = pneg %p809_p7 }
 0x312   : > { %p816_p13 = por %p815_p12, %p814_p11 }
 0x314   : > { %p817_p0 = pnand %p816_p13, %p810_p8 }
 0x316   : > { %820 = shalt.err (!%p817_p0)
}
 0x317   : > { %711 = dma.vmem_to_hbm [thread:$0]  (%p927_p5), %s1056_s23, 128, %s1054_s30, %s575_s6  }
 0x318 PF: > { %p717_p1 = scmp.ge.s32.totalorder %s855_s21, 2  ;;  %s600_s16 = sand.u32 1, %s843_s18  }
 0x319   : > { %s601_s17 = scalar_lea.sflag [#allocation3], %s600_s16 }
 0x31a   : > { %p714_p2 = pnand %p717_p1, %p931_p6 }
 0x31c   : > { %838 = dma.done.wait (!%p714_p2), %s601_s17, 128  }
 0x31d   : > { %840 = vsyncadd (!%p714_p2), %s601_s17, 4294967168  ;;  %p15_p3 = scmp.ge.s32.totalorder %s914_s24, 4   ;;  %s1104_s18 = smov %s847_s19 }
 0x31e   : > { %s1105_s19 = smov %s851_s20  ;;  %s1106_s20 = smov %s925_s27 }
 0x31f   : > { %s1107_s21 = smov %s914_s24  ;;  %17 = sbr.rel (!%p15_p3) target bundleno = 3 (0x3), region = 75 }
 0x326   :  { %606 = vsyncpa [#allocation3], 1 }
 0x327   :  { %608 = vsyncpa [#allocation3 + $0x1], 1 }

</bundles_post_ra>
